<compile_context>
chip_gen: v6e
topology: v6e:2x2x1
jax: 0.10.0
libtpu: 0.0.40
codegen_flags: <defaults>
</compile_context>

<pallas_src>
import functools
import math

import jax
import jax.numpy as jnp
from jax import lax
from jax.experimental import pallas as pl
from jax.experimental.pallas import tpu as pltpu


def _pick_tile(hw):
    # 256-row tiles fill the 256-wide MXU on v6e/v7x; 128 is fine (and fills
    # the 4x128 MXU) on v5e and for small images.
    if hw % 256 == 0 and hw > 256:
        return 256
    if hw % 128 == 0:
        return 128
    # TODO(synk): non-128-aligned H*W falls back to a single tile; pad H*W or
    # add key tiling before relying on this path at large resolutions.
    return hw


# --------------------------------------------------------------------------
# Kernel 1: GroupNorm fold + fused K/V projection (per batch element).
# --------------------------------------------------------------------------
def _prepass_kernel(x_ref, gamma_ref, beta_ref, gmap_ref, wkv_ref, bkv_ref,
                    scale_ref, shift_ref, k_ref, v_ref, *, eps, tkv):
    # x_ref:     (1, HW, C)  raw input, channels-last
    # gamma/beta_ref: (1, C) GroupNorm affine
    # gmap_ref:  (C, C)      channel -> group-mean matrix (includes 1/(HW*cg))
    # wkv_ref:   (C, 2C) bf16 fused [Wk | Wv];  bkv_ref: (1, 2C) f32
    # scale/shift_ref: (1, 1, C) f32 outputs (folded GroupNorm)
    # k_ref/v_ref: (1, HW, C) bf16 outputs
    HW = x_ref.shape[1]
    C = x_ref.shape[2]
    n_chunks = HW // tkv

    # -- pass 1: per-channel sums / sums of squares, chunked over HW --------
    def stats_body(i, carry):
        s, ss = carry
        r0 = pl.multiple_of(i * tkv, tkv)
        xc = x_ref[0, pl.ds(r0, tkv), :].astype(jnp.float32)      # (tkv, C)
        return (s + jnp.sum(xc, axis=0, keepdims=True),
                ss + jnp.sum(xc * xc, axis=0, keepdims=True))

    zero = jnp.zeros((1, C), jnp.float32)
    s, ss = lax.fori_loop(0, n_chunks, stats_body, (zero, zero))

    # group means broadcast back to per-channel via one tiny matmul
    mean = jnp.dot(s, gmap_ref[...], preferred_element_type=jnp.float32)
    ex2 = jnp.dot(ss, gmap_ref[...], preferred_element_type=jnp.float32)
    var = ex2 - mean * mean
    inv = lax.rsqrt(var + eps)
    gamma = gamma_ref[...].astype(jnp.float32)
    beta = beta_ref[...].astype(jnp.float32)
    scale = inv * gamma                                            # (1, C)
    shift = beta - mean * scale                                    # (1, C)
    scale_ref[0] = scale
    shift_ref[0] = shift

    # -- pass 2: normalize + fused K/V projection, chunked over HW ----------
    wkv = wkv_ref[...]                                             # (C, 2C) bf16
    bkv = bkv_ref[...]                                             # (1, 2C) f32

    def proj_body(i, carry):
        r0 = pl.multiple_of(i * tkv, tkv)
        xc = x_ref[0, pl.ds(r0, tkv), :].astype(jnp.float32)
        nx = (xc * scale + shift).astype(jnp.bfloat16)             # (tkv, C)
        kv = jnp.dot(nx, wkv, preferred_element_type=jnp.float32) + bkv
        k_ref[0, pl.ds(r0, tkv), :] = kv[:, :C].astype(jnp.bfloat16)
        v_ref[0, pl.ds(r0, tkv), :] = kv[:, C:].astype(jnp.bfloat16)
        return carry

    lax.fori_loop(0, n_chunks, proj_body, 0)


# --------------------------------------------------------------------------
# Kernel 2: attention over one query tile (fully parallel grid).
# --------------------------------------------------------------------------
def _attn_kernel(x_ref, scale_ref, shift_ref, k_ref, v_ref,
                 wq_ref, bq_ref, wp_ref, bp_ref, o_ref):
    # x_ref:   (1, TQ, C)  raw input tile (also used for the residual)
    # scale/shift_ref: (1, 1, C) f32 folded GroupNorm for this batch element
    # k_ref/v_ref: (1, HW, C) bf16
    # wq_ref: (C, C) bf16 (1/sqrt(C) pre-folded);  bq_ref: (1, C) f32 (folded)
    # wp_ref: (C, C) bf16;  bp_ref: (1, C) f32
    xq = x_ref[0].astype(jnp.float32)                              # (TQ, C)
    scale = scale_ref[0]                                           # (1, C)
    shift = shift_ref[0]
    nxq = (xq * scale + shift).astype(jnp.bfloat16)

    q = (jnp.dot(nxq, wq_ref[...], preferred_element_type=jnp.float32)
         + bq_ref[...])                                            # (TQ, C)

    # scores[i, j] = (q_i . k_j) / sqrt(C)   (scale already folded into Wq,bq)
    scores = lax.dot_general(
        q.astype(jnp.bfloat16), k_ref[0],
        (((1,), (1,)), ((), ())),
        preferred_element_type=jnp.float32)                        # (TQ, HW)

    # row softmax with deferred normalization (keep elementwise math in f32)
    m = jnp.max(scores, axis=-1, keepdims=True)
    p = jnp.exp(scores - m)                                        # (TQ, HW)
    l = jnp.sum(p, axis=-1, keepdims=True)                         # (TQ, 1)

    attn = jnp.dot(p.astype(jnp.bfloat16), v_ref[0],
                   preferred_element_type=jnp.float32)             # (TQ, C)
    attn = attn * pl.reciprocal(l, approx=True)

    out = (jnp.dot(attn.astype(jnp.bfloat16), wp_ref[...],
                   preferred_element_type=jnp.float32)
           + bp_ref[...])                                          # (TQ, C)

    # residual add, lane-dense store (channels last)
    o_ref[0] = (xq + out).astype(o_ref.dtype)


# --------------------------------------------------------------------------
# Wrapper
# --------------------------------------------------------------------------
def emu3_attn_block(x_nchw, gn_w, gn_b, wq, bq, wk, bk, wv, bv, wp, bp,
                    num_groups=32, eps=1e-6):
    """Forward of Emu3VisionVQAttnBlock (zq_ch=None). x_nchw: (N, C, H, W)."""
    N, C, H, W = x_nchw.shape
    assert C % num_groups == 0
    HW = H * W
    vmem_limit = 64 * 1024 * 1024   # fits v7x physical VMEM; plenty elsewhere

    # channels-last activation layout: channel contraction maps onto MXU lanes
    x = jnp.transpose(x_nchw, (0, 2, 3, 1)).reshape(N, HW, C)

    def w2d(w):  # PyTorch 1x1 conv weight (C_out, C_in, 1, 1) -> (C_in, C_out)
        return jnp.transpose(w.reshape(w.shape[0], w.shape[1]),
                             (1, 0)).astype(jnp.float32)

    inv_sqrt_c = 1.0 / math.sqrt(C)
    # bf16 MXU operands, f32 biases / accumulation; 1/sqrt(C) folded into Q.
    wq2 = (w2d(wq) * inv_sqrt_c).astype(jnp.bfloat16)              # (C, C)
    bq2 = (bq.reshape(1, C).astype(jnp.float32) * inv_sqrt_c)      # (1, C)
    wkv2 = jnp.concatenate([w2d(wk), w2d(wv)], axis=1).astype(jnp.bfloat16)
    bkv2 = jnp.concatenate([bk, bv]).reshape(1, 2 * C).astype(jnp.float32)
    wp2 = w2d(wp).astype(jnp.bfloat16)                             # (C, C)
    bp2 = bp.reshape(1, C).astype(jnp.float32)
    gamma = gn_w.reshape(1, C).astype(jnp.float32)
    beta = gn_b.reshape(1, C).astype(jnp.float32)

    # group-membership matrix: gmap[i, j] = 1/(HW*cg) iff channels i, j share a
    # GroupNorm group  ->  (1,C) channel sums @ gmap = per-channel group means.
    cg = C // num_groups
    gid = jnp.arange(C) // cg
    gmap = (gid[:, None] == gid[None, :]).astype(jnp.float32) / float(HW * cg)

    TKV = _pick_tile(HW)
    TQ = _pick_tile(HW)
    QT = HW // TQ

    # ---------------- prepass: GroupNorm fold + K/V projection -------------
    prepass = pl.pallas_call(
        functools.partial(_prepass_kernel, eps=float(eps), tkv=TKV),
        out_shape=(
            jax.ShapeDtypeStruct((N, 1, C), jnp.float32),      # scale
            jax.ShapeDtypeStruct((N, 1, C), jnp.float32),      # shift
            jax.ShapeDtypeStruct((N, HW, C), jnp.bfloat16),    # K
            jax.ShapeDtypeStruct((N, HW, C), jnp.bfloat16),    # V
        ),
        grid_spec=pltpu.PrefetchScalarGridSpec(
            num_scalar_prefetch=0,
            grid=(N,),
            in_specs=[
                pl.BlockSpec((1, HW, C), lambda n: (n, 0, 0)),     # x
                pl.BlockSpec((1, C), lambda n: (0, 0)),            # gamma
                pl.BlockSpec((1, C), lambda n: (0, 0)),            # beta
                pl.BlockSpec((C, C), lambda n: (0, 0)),            # gmap
                pl.BlockSpec((C, 2 * C), lambda n: (0, 0)),        # Wkv
                pl.BlockSpec((1, 2 * C), lambda n: (0, 0)),        # bkv
            ],
            out_specs=[
                pl.BlockSpec((1, 1, C), lambda n: (n, 0, 0)),
                pl.BlockSpec((1, 1, C), lambda n: (n, 0, 0)),
                pl.BlockSpec((1, HW, C), lambda n: (n, 0, 0)),
                pl.BlockSpec((1, HW, C), lambda n: (n, 0, 0)),
            ],
        ),
        compiler_params=pltpu.CompilerParams(
            dimension_semantics=("parallel",),
            vmem_limit_bytes=vmem_limit),
    )
    scale, shift, k_bf16, v_bf16 = prepass(x, gamma, beta, gmap, wkv2, bkv2)

    # ---------------- attention: fully parallel over (N, query tiles) ------
    out = pl.pallas_call(
        _attn_kernel,
        out_shape=jax.ShapeDtypeStruct((N, HW, C), x.dtype),
        grid_spec=pltpu.PrefetchScalarGridSpec(
            num_scalar_prefetch=0,
            grid=(N, QT),
            in_specs=[
                pl.BlockSpec((1, TQ, C), lambda n, qi: (n, qi, 0)),   # x tile
                pl.BlockSpec((1, 1, C), lambda n, qi: (n, 0, 0)),     # scale
                pl.BlockSpec((1, 1, C), lambda n, qi: (n, 0, 0)),     # shift
                pl.BlockSpec((1, HW, C), lambda n, qi: (n, 0, 0)),    # K
                pl.BlockSpec((1, HW, C), lambda n, qi: (n, 0, 0)),    # V
                pl.BlockSpec((C, C), lambda n, qi: (0, 0)),           # Wq
                pl.BlockSpec((1, C), lambda n, qi: (0, 0)),           # bq
                pl.BlockSpec((C, C), lambda n, qi: (0, 0)),           # Wproj
                pl.BlockSpec((1, C), lambda n, qi: (0, 0)),           # bproj
            ],
            out_specs=pl.BlockSpec((1, TQ, C), lambda n, qi: (n, qi, 0)),
        ),
        compiler_params=pltpu.CompilerParams(
            dimension_semantics=("parallel", "parallel"),
            vmem_limit_bytes=vmem_limit),
    )(x, scale, shift, k_bf16, v_bf16, wq2, bq2, wp2, bp2)

    # back to PyTorch's NCHW layout
    return jnp.transpose(out.reshape(N, H, W, C), (0, 3, 1, 2))


# --------------------------------------------------------------------------
# Pure-JAX reference matching the PyTorch forward exactly.
# --------------------------------------------------------------------------
def _reference(x, gn_w, gn_b, wq, bq, wk, bk, wv, bv, wp, bp,
               num_groups=32, eps=1e-6):
    N, C, H, W = x.shape
    xg = x.reshape(N, num_groups, -1)
    mean = jnp.mean(xg, axis=2, keepdims=True)
    var = jnp.var(xg, axis=2, keepdims=True)
    nx = (xg - mean) / jnp.sqrt(var + eps)
    nx = (nx.reshape(N, C, H, W) * gn_w.reshape(1, C, 1, 1)
          + gn_b.reshape(1, C, 1, 1))

    def conv1x1(t, w, b):
        w2 = w.reshape(w.shape[0], w.shape[1])
        return jnp.einsum("nchw,oc->nohw", t, w2) + b.reshape(1, -1, 1, 1)

    q = conv1x1(nx, wq, bq).reshape(N, C, H * W)
    k = conv1x1(nx, wk, bk).reshape(N, C, H * W)
    v = conv1x1(nx, wv, bv).reshape(N, C, H * W)
    score = jnp.einsum("nci,ncj->nij", q, k) / math.sqrt(C)
    score = jax.nn.softmax(score, axis=2)
    out = jnp.einsum("ncj,nij->nci", v, score).reshape(N, C, H, W)
    out = conv1x1(out, wp, bp)
    return x + out


if __name__ == "__main__":
    key = jax.random.PRNGKey(0)
    keys = jax.random.split(key, 11)

    N, C, H, W = 2, 64, 16, 16          # C must be divisible by 32 (GroupNorm)

    x = jax.random.normal(keys[0], (N, C, H, W), dtype=jnp.float32)
    gn_w = 1.0 + 0.1 * jax.random.normal(keys[1], (C,), dtype=jnp.float32)
    gn_b = 0.1 * jax.random.normal(keys[2], (C,), dtype=jnp.float32)

    def conv_w(k):
        return 0.1 * jax.random.normal(k, (C, C, 1, 1), dtype=jnp.float32)

    def conv_b(k):
        return 0.1 * jax.random.normal(k, (C,), dtype=jnp.float32)

    wq, wk, wv, wp = (conv_w(keys[3]), conv_w(keys[4]),
                      conv_w(keys[5]), conv_w(keys[6]))
    bq, bk, bv, bp = (conv_b(keys[7]), conv_b(keys[8]),
                      conv_b(keys[9]), conv_b(keys[10]))

    out = emu3_attn_block(x, gn_w, gn_b, wq, bq, wk, bk, wv, bv, wp, bp)
    out = jax.block_until_ready(out)

    ref = jax.block_until_ready(
        _reference(x, gn_w, gn_b, wq, bq, wk, bk, wv, bv, wp, bp))
    assert out.shape == ref.shape, (out.shape, ref.shape)
    err = float(jnp.max(jnp.abs(out - ref)))
    # bf16 MXU operands (f32 accumulation) + approx reciprocal: ~1e-2 relative.
    assert err < 5e-2, err

    print("KERNEL_OK")
</pallas_src>

<mosaic_0001>
module attributes {stable_mosaic.version = 11 : i64} {
  func.func @_prepass_kernel(%arg0: i32, %arg1: memref<1x256x64xf32, #tpu.memory_space<vmem>>, %arg2: memref<1x64xf32, #tpu.memory_space<vmem>>, %arg3: memref<1x64xf32, #tpu.memory_space<vmem>>, %arg4: memref<64x64xf32, #tpu.memory_space<vmem>>, %arg5: memref<64x128xbf16, #tpu.memory_space<vmem>>, %arg6: memref<1x128xf32, #tpu.memory_space<vmem>>, %arg7: memref<1x1x64xf32, #tpu.memory_space<vmem>>, %arg8: memref<1x1x64xf32, #tpu.memory_space<vmem>>, %arg9: memref<1x256x64xbf16, #tpu.memory_space<vmem>>, %arg10: memref<1x256x64xbf16, #tpu.memory_space<vmem>>) attributes {dimension_semantics = [#tpu.dimension_semantics<parallel>], iteration_bounds = array<i64: 2>, scalar_prefetch = 0 : i64, scratch_operands = 0 : i64, tpu.core_type = #tpu.core_type<tc>, window_params = [{transform_indices = @transform_0, window_bounds = array<i64: 1, 256, 64>}, {pipeline_mode = #tpu.pipeline_mode<synchronous>, transform_indices = @transform_1, window_bounds = array<i64: 1, 64>}, {pipeline_mode = #tpu.pipeline_mode<synchronous>, transform_indices = @transform_2, window_bounds = array<i64: 1, 64>}, {pipeline_mode = #tpu.pipeline_mode<synchronous>, transform_indices = @transform_3, window_bounds = array<i64: 64, 64>}, {pipeline_mode = #tpu.pipeline_mode<synchronous>, transform_indices = @transform_4, window_bounds = array<i64: 64, 128>}, {pipeline_mode = #tpu.pipeline_mode<synchronous>, transform_indices = @transform_5, window_bounds = array<i64: 1, 128>}, {transform_indices = @transform_6, window_bounds = array<i64: 1, 1, 64>}, {transform_indices = @transform_7, window_bounds = array<i64: 1, 1, 64>}, {transform_indices = @transform_8, window_bounds = array<i64: 1, 256, 64>}, {transform_indices = @transform_9, window_bounds = array<i64: 1, 256, 64>}]} {
    %cst = arith.constant 0.000000e+00 : f32
    %0 = vector.broadcast %cst : f32 to vector<1x64xf32>
    %c0_i32 = arith.constant 0 : i32
    %c2_i32 = arith.constant 2 : i32
    %1 = arith.addi %c0_i32, %c2_i32 : i32
    %c1_i32 = arith.constant 1 : i32
    %2:2 = scf.for %arg11 = %c0_i32 to %1 step %c1_i32 iter_args(%arg12 = %0, %arg13 = %0) -> (vector<1x64xf32>, vector<1x64xf32>)  : i32 {
      %c128_i32 = arith.constant 128 : i32
      %26 = arith.muli %arg11, %c128_i32 : i32
      %27 = tpu.assume_multiple %26, 128 : i32
      %c0_25 = arith.constant 0 : index
      %28 = arith.index_cast %27 : i32 to index
      %c0_26 = arith.constant 0 : index
      %29 = vector.load %arg1[%c0_25, %28, %c0_26] : memref<1x256x64xf32, #tpu.memory_space<vmem>>, vector<1x128x64xf32>
      %30 = vector.shape_cast %29 : vector<1x128x64xf32> to vector<128x64xf32>
      %cst_27 = arith.constant dense<0.000000e+00> : vector<64xf32>
      %31 = vector.multi_reduction <add>, %30, %cst_27 [0] : vector<128x64xf32> to vector<64xf32>
      %32 = vector.shape_cast %31 : vector<64xf32> to vector<1x64xf32>
      %33 = arith.addf %arg12, %32 : vector<1x64xf32>
      %34 = arith.mulf %30, %30 : vector<128x64xf32>
      %cst_28 = arith.constant dense<0.000000e+00> : vector<64xf32>
      %35 = vector.multi_reduction <add>, %34, %cst_28 [0] : vector<128x64xf32> to vector<64xf32>
      %36 = vector.shape_cast %35 : vector<64xf32> to vector<1x64xf32>
      %37 = arith.addf %arg13, %36 : vector<1x64xf32>
      scf.yield %33, %37 : vector<1x64xf32>, vector<1x64xf32>
    }
    %c2_i32_0 = arith.constant 2 : i32
    %c0 = arith.constant 0 : index
    %c0_1 = arith.constant 0 : index
    %3 = vector.load %arg4[%c0, %c0_1] : memref<64x64xf32, #tpu.memory_space<vmem>>, vector<64x64xf32>
    %cst_2 = arith.constant dense<0.000000e+00> : vector<1x64xf32>
    %4 = tpu.matmul %2#0, %3, %cst_2 {dimension_numbers = #tpu.dot_dimension_numbers<[1], [0], [0], [1], [0, 0, 1, 1], [], []>} : vector<1x64xf32>, vector<64x64xf32>, vector<1x64xf32> -> vector<1x64xf32>
    %c0_3 = arith.constant 0 : index
    %c0_4 = arith.constant 0 : index
    %5 = vector.load %arg4[%c0_3, %c0_4] : memref<64x64xf32, #tpu.memory_space<vmem>>, vector<64x64xf32>
    %cst_5 = arith.constant dense<0.000000e+00> : vector<1x64xf32>
    %6 = tpu.matmul %2#1, %5, %cst_5 {dimension_numbers = #tpu.dot_dimension_numbers<[1], [0], [0], [1], [0, 0, 1, 1], [], []>} : vector<1x64xf32>, vector<64x64xf32>, vector<1x64xf32> -> vector<1x64xf32>
    %7 = arith.mulf %4, %4 : vector<1x64xf32>
    %8 = arith.subf %6, %7 : vector<1x64xf32>
    %cst_6 = arith.constant 9.99999997E-7 : f32
    %9 = vector.broadcast %cst_6 : f32 to vector<1x64xf32>
    %10 = arith.addf %8, %9 : vector<1x64xf32>
    %11 = math.rsqrt %10 : vector<1x64xf32>
    %c0_7 = arith.constant 0 : index
    %c0_8 = arith.constant 0 : index
    %12 = vector.load %arg2[%c0_7, %c0_8] : memref<1x64xf32, #tpu.memory_space<vmem>>, vector<1x64xf32>
    %c0_9 = arith.constant 0 : index
    %c0_10 = arith.constant 0 : index
    %13 = vector.load %arg3[%c0_9, %c0_10] : memref<1x64xf32, #tpu.memory_space<vmem>>, vector<1x64xf32>
    %14 = arith.mulf %11, %12 : vector<1x64xf32>
    %15 = arith.mulf %4, %14 : vector<1x64xf32>
    %16 = arith.subf %13, %15 : vector<1x64xf32>
    %c0_11 = arith.constant 0 : index
    %c0_12 = arith.constant 0 : index
    %c0_13 = arith.constant 0 : index
    %17 = vector.load %arg7[%c0_11, %c0_12, %c0_13] : memref<1x1x64xf32, #tpu.memory_space<vmem>>, vector<1x1x64xf32>
    %18 = vector.shape_cast %17 : vector<1x1x64xf32> to vector<1x64xf32>
    %19 = vector.shape_cast %14 : vector<1x64xf32> to vector<1x1x64xf32>
    tpu.vector_store %arg7[%c0_11, %c0_12, %c0_13], %19 {strides = array<i32>} : memref<1x1x64xf32, #tpu.memory_space<vmem>>, vector<1x1x64xf32>,
    %c0_14 = arith.constant 0 : index
    %c0_15 = arith.constant 0 : index
    %c0_16 = arith.constant 0 : index
    %20 = vector.load %arg8[%c0_14, %c0_15, %c0_16] : memref<1x1x64xf32, #tpu.memory_space<vmem>>, vector<1x1x64xf32>
    %21 = vector.shape_cast %20 : vector<1x1x64xf32> to vector<1x64xf32>
    %22 = vector.shape_cast %16 : vector<1x64xf32> to vector<1x1x64xf32>
    tpu.vector_store %arg8[%c0_14, %c0_15, %c0_16], %22 {strides = array<i32>} : memref<1x1x64xf32, #tpu.memory_space<vmem>>, vector<1x1x64xf32>,
    %c0_17 = arith.constant 0 : index
    %c0_18 = arith.constant 0 : index
    %23 = vector.load %arg5[%c0_17, %c0_18] : memref<64x128xbf16, #tpu.memory_space<vmem>>, vector<64x128xbf16>
    %c0_19 = arith.constant 0 : index
    %c0_20 = arith.constant 0 : index
    %24 = vector.load %arg6[%c0_19, %c0_20] : memref<1x128xf32, #tpu.memory_space<vmem>>, vector<1x128xf32>
    %c0_i32_21 = arith.constant 0 : i32
    %c2_i32_22 = arith.constant 2 : i32
    %25 = arith.addi %c0_i32_21, %c2_i32_22 : i32
    %c1_i32_23 = arith.constant 1 : i32
    scf.for %arg11 = %c0_i32_21 to %25 step %c1_i32_23  : i32 {
      %c128_i32 = arith.constant 128 : i32
      %26 = arith.muli %arg11, %c128_i32 : i32
      %27 = tpu.assume_multiple %26, 128 : i32
      %c0_25 = arith.constant 0 : index
      %28 = arith.index_cast %27 : i32 to index
      %c0_26 = arith.constant 0 : index
      %29 = vector.load %arg1[%c0_25, %28, %c0_26] : memref<1x256x64xf32, #tpu.memory_space<vmem>>, vector<1x128x64xf32>
      %30 = vector.shape_cast %29 : vector<1x128x64xf32> to vector<128x64xf32>
      %31 = vector.broadcast %14 : vector<1x64xf32> to vector<128x64xf32>
      %32 = arith.mulf %30, %31 : vector<128x64xf32>
      %33 = vector.broadcast %16 : vector<1x64xf32> to vector<128x64xf32>
      %34 = arith.addf %32, %33 : vector<128x64xf32>
      %35 = arith.truncf %34 : vector<128x64xf32> to vector<128x64xbf16>
      %cst_27 = arith.constant dense<0.000000e+00> : vector<128x128xf32>
      %36 = tpu.matmul %35, %23, %cst_27 {dimension_numbers = #tpu.dot_dimension_numbers<[1], [0], [0], [1], [0, 0, 1, 1], [], []>} : vector<128x64xbf16>, vector<64x128xbf16>, vector<128x128xf32> -> vector<128x128xf32>
      %37 = vector.broadcast %24 : vector<1x128xf32> to vector<128x128xf32>
      %38 = arith.addf %36, %37 : vector<128x128xf32>
      %39 = vector.extract_strided_slice %38 {offsets = [0, 0], sizes = [128, 64], strides = [1, 1]} : vector<128x128xf32> to vector<128x64xf32>
      %40 = arith.truncf %39 : vector<128x64xf32> to vector<128x64xbf16>
      %c0_28 = arith.constant 0 : index
      %41 = arith.index_cast %27 : i32 to index
      %c0_29 = arith.constant 0 : index
      %42 = vector.load %arg9[%c0_28, %41, %c0_29] : memref<1x256x64xbf16, #tpu.memory_space<vmem>>, vector<1x128x64xbf16>
      %43 = vector.shape_cast %42 : vector<1x128x64xbf16> to vector<128x64xbf16>
      %44 = vector.shape_cast %40 : vector<128x64xbf16> to vector<1x128x64xbf16>
      tpu.vector_store %arg9[%c0_28, %41, %c0_29], %44 {strides = array<i32>} : memref<1x256x64xbf16, #tpu.memory_space<vmem>>, vector<1x128x64xbf16>,
      %45 = vector.extract_strided_slice %38 {offsets = [0, 64], sizes = [128, 64], strides = [1, 1]} : vector<128x128xf32> to vector<128x64xf32>
      %46 = arith.truncf %45 : vector<128x64xf32> to vector<128x64xbf16>
      %c0_30 = arith.constant 0 : index
      %47 = arith.index_cast %27 : i32 to index
      %c0_31 = arith.constant 0 : index
      %48 = vector.load %arg10[%c0_30, %47, %c0_31] : memref<1x256x64xbf16, #tpu.memory_space<vmem>>, vector<1x128x64xbf16>
      %49 = vector.shape_cast %48 : vector<1x128x64xbf16> to vector<128x64xbf16>
      %50 = vector.shape_cast %46 : vector<128x64xbf16> to vector<1x128x64xbf16>
      tpu.vector_store %arg10[%c0_30, %47, %c0_31], %50 {strides = array<i32>} : memref<1x256x64xbf16, #tpu.memory_space<vmem>>, vector<1x128x64xbf16>,
    }
    %c2_i32_24 = arith.constant 2 : i32
    return
  }
  func.func @transform_0(%arg0: i32) -> (i32, i32, i32) {
    %c0_i32 = arith.constant 0 : i32
    %c0_i32_0 = arith.constant 0 : i32
    %c0_i32_1 = arith.constant 0 : i32
    return %arg0, %c0_i32, %c0_i32_0 : i32, i32, i32
  }
  func.func @transform_1(%arg0: i32) -> (i32, i32) {
    %c0_i32 = arith.constant 0 : i32
    %c0_i32_0 = arith.constant 0 : i32
    %c0_i32_1 = arith.constant 0 : i32
    return %c0_i32, %c0_i32_0 : i32, i32
  }
  func.func @transform_2(%arg0: i32) -> (i32, i32) {
    %c0_i32 = arith.constant 0 : i32
    %c0_i32_0 = arith.constant 0 : i32
    %c0_i32_1 = arith.constant 0 : i32
    return %c0_i32, %c0_i32_0 : i32, i32
  }
  func.func @transform_3(%arg0: i32) -> (i32, i32) {
    %c0_i32 = arith.constant 0 : i32
    %c0_i32_0 = arith.constant 0 : i32
    %c0_i32_1 = arith.constant 0 : i32
    return %c0_i32, %c0_i32_0 : i32, i32
  }
  func.func @transform_4(%arg0: i32) -> (i32, i32) {
    %c0_i32 = arith.constant 0 : i32
    %c0_i32_0 = arith.constant 0 : i32
    %c0_i32_1 = arith.constant 0 : i32
    return %c0_i32, %c0_i32_0 : i32, i32
  }
  func.func @transform_5(%arg0: i32) -> (i32, i32) {
    %c0_i32 = arith.constant 0 : i32
    %c0_i32_0 = arith.constant 0 : i32
    %c0_i32_1 = arith.constant 0 : i32
    return %c0_i32, %c0_i32_0 : i32, i32
  }
  func.func @transform_6(%arg0: i32) -> (i32, i32, i32) {
    %c0_i32 = arith.constant 0 : i32
    %c0_i32_0 = arith.constant 0 : i32
    %c0_i32_1 = arith.constant 0 : i32
    return %arg0, %c0_i32, %c0_i32_0 : i32, i32, i32
  }
  func.func @transform_7(%arg0: i32) -> (i32, i32, i32) {
    %c0_i32 = arith.constant 0 : i32
    %c0_i32_0 = arith.constant 0 : i32
    %c0_i32_1 = arith.constant 0 : i32
    return %arg0, %c0_i32, %c0_i32_0 : i32, i32, i32
  }
  func.func @transform_8(%arg0: i32) -> (i32, i32, i32) {
    %c0_i32 = arith.constant 0 : i32
    %c0_i32_0 = arith.constant 0 : i32
    %c0_i32_1 = arith.constant 0 : i32
    return %arg0, %c0_i32, %c0_i32_0 : i32, i32, i32
  }
  func.func @transform_9(%arg0: i32) -> (i32, i32, i32) {
    %c0_i32 = arith.constant 0 : i32
    %c0_i32_0 = arith.constant 0 : i32
    %c0_i32_1 = arith.constant 0 : i32
    return %arg0, %c0_i32, %c0_i32_0 : i32, i32, i32
  }
}

</mosaic_0001>

<bundles_post_ra>
// kernel: tpu_custom_call.1
= control target key start
LH: loop header
LB: loop body
LE: loop exit
PB: predicated region body
PF: predicated region fallthrough
CT: control target
= control target key end

     0   :  { %15 = vsyncpa [#allocation3], 0  ;;  %s2118_s0 = inlined_call_operand.vmem [shape: f32[2,256,64], index: 0, kind: input, shape index: {}]   ;;  %s2119_s1 = inlined_call_operand.vmem [shape: f32[1,64], index: 1, kind: input, shape index: {}]   ;;  %s2120_s2 = inlined_call_operand.vmem [shape: f32[1,64], index: 2, kind: input, shape index: {}]   ;;  %s2121_s3 = inlined_call_operand.vmem [shape: f32[64,64], index: 3, kind: input, shape index: {}]   ;;  %s2122_s4 = inlined_call_operand.vmem [shape: bf16[64,128], index: 4, kind: input, shape index: {}]   ;;  %s2123_s5 = inlined_call_operand.vmem [shape: f32[1,128], index: 5, kind: input, shape index: {}]   ;;  %s2124_s6 = inlined_call_operand.hbm [shape: f32[2,1,64], index: 6, kind: output, shape index: {0}]   ;;  %s2125_s7 = inlined_call_operand.hbm [shape: f32[2,1,64], index: 7, kind: output, shape index: {1}]   ;;  %s2126_s8 = inlined_call_operand.vmem [shape: bf16[2,256,64], index: 8, kind: output, shape index: {2}]   ;;  %s2127_s9 = inlined_call_operand.vmem [shape: bf16[2,256,64], index: 9, kind: output, shape index: {3}]  }
   0x1   :  { %17 = vsyncpa [#allocation3 + $0x1], 0 }
   0x2   :  { %18 = vsyncpa [#allocation5], 0 }
   0x3   :  { %20 = vsyncpa [#allocation5 + $0x1], 0  ;;  %s1667_s30 = smov 0   ;;  %s1669_s10 = smov 0  }
   0x4   :  { %s1671_s11 = smov 0   ;;  %s1673_s12 = smov 0  }
   0x5 LB: > { %2130 = sst [smem:[#allocation8_spill]] %s1586_s10  ;;  %s1688_s13 = sadd.s32 4294967295, %s1594_s12   ;;  %s1594_s12 = sphi %s1673_s12, %s2142_s12   ;;  %s1590_s11 = sphi %s1671_s11, %s2141_s11   ;;  %s1586_s10 = sphi %s1669_s10, %s2140_s10   ;;  %s1582_s30 = sphi %s1667_s30, %s2139_s30  }
   0x6   : > { %2131 = sst [smem:[#allocation9_spill]] %s1590_s11  ;;  %s1239_s14 = sadd.s32 4294967294, %s1594_s12  }
   0x7   : > { %s1692_s15 = sadd.s32 1, %s1594_s12   ;;  %s164_s16 = sadd.s32 1, %s1590_s11 }
   0x8   : > { %s161_s17 = ssub.s32 %s1594_s12, %s1692_s15  ;;  %p174_p0 = scmp.ne.s32.totalorder %s1590_s11, %s1586_s10 }
   0x9   : > { %p162_p1 = scmp.eq.s32.totalorder %s161_s17, 0  ;;  %p175_p2 = scmp.eq.s32.totalorder %s1688_s13, 1 }
   0xa   : > { %p180_p3 = scmp.ne.s32.totalorder %s1586_s10, %s1582_s30  ;;  %p181_p4 = scmp.eq.s32.totalorder %s1239_s14, 1 }
   0xb   : > { %s1703_s18 = scalar_select %p162_p1, %s1590_s11, %s164_s16  }
   0xc   : > { %p1705_p5 = por %p175_p2, %p174_p0  ;;  %p1709_p6 = por %p181_p4, %p180_p3 }
   0xd   : > { %2132 = sst [smem:[#allocation10_spill]] %s1703_s18  ;;  %p1242_p7 = scmp.ge.s32.totalorder %s1594_s12, 1 }
   0xe   : > { %p300_p8 = scmp.lt.s32.totalorder %s1594_s12, 3 }
  0x10   : > { %p301_p9 = pnand %p1242_p7, %p300_p8 }
  0x11   : > { %s1716_s21 = sand.u32 (!%p301_p9), 1, %s1586_s10   ;;  %p349_p10 = scmp.lt.s32.totalorder (!%p301_p9), %s1688_s13, 1 }
  0x12   : > { %304 = sbr.rel (%p301_p9) target bundleno = 708 (0x2c4), region = 44  ;;  %s328_s11 = scalar_lea.vmem (!%p301_p9), [#allocation2], %s1716_s21 }
  0x17   : > { %s350_s22 = scalar_select %p349_p10, %s1688_s13, 1  ;;  %v1737_v0 = vmov 0.0   ;;  %v1739_v1 = vmov 0.0  }
  0x19   : > { %s1288_s23 = sshll.u32 %s350_s22, 8  ;;  %s1289_s24 = sshll.u32 %s350_s22, 7 }
  0x1a   : > { %s1723_s27 = scalar_lea.vmem %s2118_s0, %s1288_s23  ;;  %s1728_s14 = scalar_lea.vmem %s2126_s8, %s1289_s24 }
  0x1b   : > { %s1733_s18 = scalar_lea.vmem %s2127_s9, %s1289_s24  ;;  %s1741_s22 = smov 0  }
  0x1c LB: >> { %s1249_s23 = sshll.u32 %s1606_s22, 7  ;;  %vm391_vm0 = vcmask 523264   ;;  %s370_s22 = sadd.s32 1, %s1606_s22   ;;  %s1606_s22 = sphi %s1741_s22, %s370_s22   ;;  %v1602_v1 = vphi %v1739_v1, %v2136_v1   ;;  %v1598_v0 = vphi %v1737_v0, %v2135_v0  }
  0x1d   : >> { %s1754_s24 = scalar_lea.vmem %s1723_s27, %s1249_s23  ;;  %p367_p11 = scmp.ge.s32.totalorder %s370_s22, 2  }
  0x1e   : >> { %v375_v2 = vld [vmem:[%s1754_s24] sm:$0xff]  ;;  %v376_v3 = vld [vmem:[%s1754_s24 + $0x8] sm:$0xff]  ;;  %v377_v4 = vld [vmem:[%s1754_s24 + $0x10] sm:$0xff]  ;;  %vm1613_vm1 = vmmov (%p367_p11), 0   ;;  %vm648_vm2 = vcmask (%p367_p11), 516096   ;;  %s2137_s25 = scalar_lea.vmem (%p367_p11), [#allocation4], %s1716_s21 }
  0x1f   : >> { %v392_v5 = vsel %vm391_vm0, %v375_v2, 0.0  ;;  %v393_v6 = vsel %vm391_vm0, %v376_v3, 0.0  ;;  %v395_v7 = vsel %vm391_vm0, %v377_v4, 0.0  ;;  %v378_v8 = vld [vmem:[%s1754_s24 + $0x18] sm:$0xff]  ;;  %v379_v11 = vld [vmem:[%s1754_s24 + $0x20] sm:$0xff]  ;;  %v380_v14 = vld [vmem:[%s1754_s24 + $0x28] sm:$0xff]  ;;  %v430_v16 = vmul.f32 %v375_v2, %v375_v2 }
  0x20   : >> { %v394_v9 = vadd.f32 %v393_v6, %v392_v5  ;;  %v397_v10 = vsel %vm391_vm0, %v378_v8, 0.0  ;;  %v399_v13 = vsel %vm391_vm0, %v379_v11, 0.0  ;;  %v431_v17 = vmul.f32 %v376_v3, %v376_v3  ;;  %v381_v20 = vld [vmem:[%s1754_s24 + $0x30] sm:$0xff]  ;;  %v382_v25 = vld [vmem:[%s1754_s24 + $0x38] sm:$0xff]  ;;  %v383_v32 = vld [vmem:[%s1754_s24 + $0x40] sm:$0xff]  ;;  %s1901_s26 = smov (%p367_p11), 0  }
  0x21   : >> { %v432_v18 = vmul.f32 %v377_v4, %v377_v4  ;;  %v401_v19 = vsel %vm391_vm0, %v380_v14, 0.0  ;;  %v433_v22 = vmul.f32 %v378_v8, %v378_v8  ;;  %v403_v23 = vsel %vm391_vm0, %v381_v20, 0.0  ;;  %v384_v38 = vld [vmem:[%s1754_s24 + $0x48] sm:$0xff]  ;;  %v385_v44 = vld [vmem:[%s1754_s24 + $0x50] sm:$0xff]  ;;  %v386_v50 = vld [vmem:[%s1754_s24 + $0x58] sm:$0xff] }
  0x22   : >> { %v396_v12 = vadd.f32 %v395_v7, %v394_v9  ;;  %v434_v24 = vmul.f32 %v379_v11, %v379_v11  ;;  %v446_v27 = vsel %vm391_vm0, %v430_v16, 0.0  ;;  %v447_v28 = vsel %vm391_vm0, %v431_v17, 0.0  ;;  %v387_v56 = vld [vmem:[%s1754_s24 + $0x60] sm:$0xff]  ;;  %v388_v62 = vld [vmem:[%s1754_s24 + $0x68] sm:$0xff]  ;;  %v389_v6 = vld [vmem:[%s1754_s24 + $0x70] sm:$0xff] }
  0x23   : >> { %v449_v29 = vsel %vm391_vm0, %v432_v18, 0.0  ;;  %v405_v30 = vsel %vm391_vm0, %v382_v25, 0.0  ;;  %v448_v31 = vadd.f32 %v447_v28, %v446_v27  ;;  %v435_v34 = vmul.f32 %v380_v14, %v380_v14 }
  0x24   : >> { %v398_v15 = vadd.f32 %v397_v10, %v396_v12  ;;  %v451_v35 = vsel %vm391_vm0, %v433_v22, 0.0  ;;  %v407_v36 = vsel %vm391_vm0, %v383_v32, 0.0  ;;  %v436_v40 = vmul.f32 %v381_v20, %v381_v20  ;;  %v390_v12 = vld [vmem:[%s1754_s24 + $0x78] sm:$0xff] }
  0x25   : >> { %v450_v37 = vadd.f32 %v449_v29, %v448_v31  ;;  %v453_v41 = vsel %vm391_vm0, %v434_v24, 0.0  ;;  %v409_v42 = vsel %vm391_vm0, %v384_v38, 0.0  ;;  %v437_v46 = vmul.f32 %v382_v25, %v382_v25 }
  0x26   : >> { %v400_v21 = vadd.f32 %v399_v13, %v398_v15  ;;  %v455_v47 = vsel %vm391_vm0, %v435_v34, 0.0  ;;  %v411_v48 = vsel %vm391_vm0, %v385_v44, 0.0  ;;  %v438_v52 = vmul.f32 %v383_v32, %v383_v32 }
  0x27   : >> { %v452_v43 = vadd.f32 %v451_v35, %v450_v37  ;;  %v457_v53 = vsel %vm391_vm0, %v436_v40, 0.0  ;;  %v413_v54 = vsel %vm391_vm0, %v386_v50, 0.0  ;;  %v439_v58 = vmul.f32 %v384_v38, %v384_v38 }
  0x28   : >> { %v402_v26 = vadd.f32 %v401_v19, %v400_v21  ;;  %v459_v59 = vsel %vm391_vm0, %v437_v46, 0.0  ;;  %v415_v60 = vsel %vm391_vm0, %v387_v56, 0.0  ;;  %v440_v2 = vmul.f32 %v385_v44, %v385_v44 }
  0x29   : >> { %v454_v49 = vadd.f32 %v453_v41, %v452_v43  ;;  %v461_v3 = vsel %vm391_vm0, %v438_v52, 0.0  ;;  %v417_v4 = vsel %vm391_vm0, %v388_v62, 0.0  ;;  %v441_v8 = vmul.f32 %v386_v50, %v386_v50  ;;  %v489_v50 = vld [vmem:[%s2121_s3 + $0x28] sm:$0xff] (%p367_p11)  ;;  %v486_v52 = vld [vmem:[%s2121_s3 + $0x10] sm:$0xff] (%p367_p11) }
  0x2a   : >> { %v404_v33 = vadd.f32 %v403_v23, %v402_v26  ;;  %v463_v9 = vsel %vm391_vm0, %v439_v58, 0.0  ;;  %v419_v10 = vsel %vm391_vm0, %v389_v6, 0.0  ;;  %v442_v14 = vmul.f32 %v387_v56, %v387_v56  ;;  %v1847_v56 = vld [vmem:[%s2122_s4 + $0x4] sm:$0xf] (%p367_p11)  ;;  %v1857_v58 = vld [vmem:[%s2122_s4 + $0xc] sm:$0xf] (%p367_p11) }
  0x2b   : >> { %v456_v55 = vadd.f32 %v455_v47, %v454_v49  ;;  %v465_v15 = vsel %vm391_vm0, %v440_v2, 0.0  ;;  %v421_v16 = vsel %vm391_vm0, %v390_v12, 0.0  ;;  %v443_v19 = vmul.f32 %v388_v62, %v388_v62  ;;  %v490_v49 = vld [vmem:[%s2121_s3 + $0x30] sm:$0xff] (%p367_p11)  ;;  %v1877_v62 = vld [vmem:[%s2122_s4 + $0x1c] sm:$0xf] (%p367_p11) }
  0x2c   : >> { %v406_v39 = vadd.f32 %v405_v30, %v404_v33  ;;  %v467_v20 = vsel %vm391_vm0, %v441_v8, 0.0  ;;  %v444_v23 = vmul.f32 %v389_v6, %v389_v6  ;;  %v469_v24 = vsel %vm391_vm0, %v442_v14, 0.0 }
  0x2d   : >> { %v458_v61 = vadd.f32 %v457_v53, %v456_v55  ;;  %v445_v27 = vmul.f32 %v390_v12, %v390_v12  ;;  %v471_v28 = vsel %vm391_vm0, %v443_v19, 0.0  ;;  %v485_v53 = vld [vmem:[%s2121_s3 + $0x8] sm:$0xff] (%p367_p11)  ;;  %v1842_v55 = vld [vmem:[%s2122_s4] sm:$0xf] (%p367_p11) }
  0x2e   : >> { %v408_v45 = vadd.f32 %v407_v36, %v406_v39  ;;  %v473_v31 = vsel %vm391_vm0, %v444_v23, 0.0  ;;  %v644_v12 = vld [vmem:[%s2120_s2] sm:$0x1] (%p367_p11) }
  0x2f   : >> { %v460_v5 = vadd.f32 %v459_v59, %v458_v61  ;;  %v475_v34 = vsel %vm391_vm0, %v445_v27, 0.0  ;;  %v1862_v59 = vld [vmem:[%s2122_s4 + $0x10] sm:$0xf] (%p367_p11)  ;;  %v1872_v61 = vld [vmem:[%s2122_s4 + $0x18] sm:$0xf] (%p367_p11) }
  0x30   : >> { %v410_v51 = vadd.f32 %v409_v42, %v408_v45 }
  0x31   : >> { %v462_v11 = vadd.f32 %v461_v3, %v460_v5 }
  0x32   : >> { %v412_v57 = vadd.f32 %v411_v48, %v410_v51  ;;  %v1612_v48 = vmov (%p367_p11), 0.0   ;;  %v487_v51 = vld [vmem:[%s2121_s3 + $0x18] sm:$0xff] (%p367_p11) }
  0x33   : >> { %v464_v17 = vadd.f32 %v463_v9, %v462_v11  ;;  %1337 = vmatprep.subr.mxu0 (%p367_p11), %v1612_v48  ;;  %1356 = vmatprep.subr.mxu1 (%p367_p11), %v1612_v48  ;;  %v643_v9 = vld [vmem:[%s2119_s1] sm:$0x1] (%p367_p11) }
  0x34   : >> { %v414_v63 = vadd.f32 %v413_v54, %v412_v57  ;;  %v484_v54 = vld [vmem:[%s2121_s3] sm:$0xff] (%p367_p11)  ;;  %1353 = vmatprep.mubr.msk.f32.mxu0 (%p367_p11), %vm1613_vm1, %v1612_v48  ;;  %1372 = vmatprep.mubr.msk.f32.mxu1 (%p367_p11), %vm1613_vm1, %v1612_v48  ;;  %v1852_v57 = vld [vmem:[%s2122_s4 + $0x8] sm:$0xf] (%p367_p11) }
  0x35   : >> { %v466_v21 = vadd.f32 %v465_v15, %v464_v17 }
  0x36   : >> { %v416_v7 = vadd.f32 %v415_v60, %v414_v63  ;;  %v1867_v60 = vld [vmem:[%s2122_s4 + $0x14] sm:$0xf] (%p367_p11)  ;;  %v1882_v63 = vld [vmem:[%s2123_s5] ss:$0 sm:$0xff] (%p367_p11) }
  0x37   : >> { %v468_v25 = vadd.f32 %v467_v20, %v466_v21 }
  0x38   : >> { %v418_v13 = vadd.f32 %v417_v4, %v416_v7 }
  0x39   : >> { %v470_v29 = vadd.f32 %v469_v24, %v468_v25 }
  0x3a   : >> { %v420_v18 = vadd.f32 %v419_v10, %v418_v13 }
  0x3b   : >> { %v472_v32 = vadd.f32 %v471_v28, %v470_v29 }
  0x3c   : >> { %v422_v22 = vadd.f32 %v421_v16, %v420_v18 }
  0x3d   : >> { %v474_v35 = vadd.f32 %v473_v31, %v472_v32 }
  0x3e   : >> { %v423_v26 = vrot.slane %v422_v22, 4 }
  0x3f   : >> { %v476_v37 = vadd.f32 %v475_v34, %v474_v35 }
  0x40   : >> { %v424_v30 = vadd.f32 %v423_v26, %v422_v22 }
  0x41   : >> { %v477_v39 = vrot.slane %v476_v37, 4 }
  0x42   : >> { %v425_v33 = vrot.slane %v424_v30, 2 }
  0x43   : >> { %v478_v41 = vadd.f32 %v477_v39, %v476_v37 }
  0x44   : >> { %v426_v36 = vadd.f32 %v425_v33, %v424_v30 }
  0x45   : >> { %v479_v43 = vrot.slane %v478_v41, 2 }
  0x46   : >> { %v427_v38 = vrot.slane %v426_v36, 1 }
  0x47   : >> { %v480_v44 = vadd.f32 %v479_v43, %v478_v41 }
  0x48   : >> { %v428_v40 = vadd.f32 %v427_v38, %v426_v36 }
  0x49   : >> { %v481_v45 = vrot.slane %v480_v44, 1 }
  0x4a   : >> { %v429_v42 = vadd.f32 %v1602_v1, %v428_v40  }
  0x4b   : >> { %v482_v46 = vadd.f32 %v481_v45, %v480_v44  ;;  %369 = sbr.rel (!%p367_p11) target bundleno = 28 (0x1c), region = 138 }
  0x4c   : >> { %v2136_v1 = vmov %v429_v42 }
  0x4d   : >> { %v483_v47 = vadd.f32 %v1598_v0, %v482_v46   ;;  %v491_v1 = vld [vmem:[%s2121_s3 + $0x38] sm:$0xff] (%p367_p11) }
  0x4e   : > { %1338 = vmatpush3.msra.mxu0 (%p367_p11), %v491_v1  ;;  %1357 = vmatpush3.msra.mxu1 (%p367_p11), %v491_v1 }
  0x4f   : >> { %v2135_v0 = vmov %v483_v47  ;;  %1339 = vmatprep.subr.mxu0 (%p367_p11), %v1612_v48  ;;  %1358 = vmatprep.subr.mxu1 (%p367_p11), %v1612_v48 }
  0x50   : > { %1340 = vmatpush3.msra.mxu0 %v490_v49  ;;  %1359 = vmatpush3.msra.mxu1 %v490_v49  ;;  %v488_v0 = vld [vmem:[%s2121_s3 + $0x20] sm:$0xff] }
  0x51   : > { %1341 = vmatprep.subr.mxu0 %v1612_v48  ;;  %1360 = vmatprep.subr.mxu1 %v1612_v48 }
  0x52   : > { %1342 = vmatpush3.msra.mxu0 %v489_v50  ;;  %1361 = vmatpush3.msra.mxu1 %v489_v50 }
  0x53   : > { %1343 = vmatprep.subr.mxu0 %v1612_v48  ;;  %1362 = vmatprep.subr.mxu1 %v1612_v48 }
  0x54   : > { %1344 = vmatpush3.msra.mxu0 %v488_v0  ;;  %1363 = vmatpush3.msra.mxu1 %v488_v0 }
  0x55   : > { %1345 = vmatprep.subr.mxu0 %v1612_v48  ;;  %1364 = vmatprep.subr.mxu1 %v1612_v48 }
  0x56   : > { %1346 = vmatpush3.msra.mxu0 %v487_v51  ;;  %1365 = vmatpush3.msra.mxu1 %v487_v51 }
  0x57   : > { %1347 = vmatprep.subr.mxu0 %v1612_v48  ;;  %1366 = vmatprep.subr.mxu1 %v1612_v48 }
  0x58   : > { %1348 = vmatpush3.msra.mxu0 %v486_v52  ;;  %1367 = vmatpush3.msra.mxu1 %v486_v52 }
  0x59   : > { %1349 = vmatprep.subr.mxu0 %v1612_v48  ;;  %1368 = vmatprep.subr.mxu1 %v1612_v48 }
  0x5a   : > { %1350 = vmatpush3.msra.mxu0 %v485_v53  ;;  %1369 = vmatpush3.msra.mxu1 %v485_v53 }
  0x5b   : > { %1351 = vmatprep.subr.mxu0 %v1612_v48  ;;  %1370 = vmatprep.subr.mxu1 %v1612_v48 }
  0x5c   : > { %1352 = vmatpush3.msra.mxu0 %v484_v54  ;;  %1371 = vmatpush3.msra.mxu1 %v484_v54 }
  0x5d   : > { %1354 = vmatmul.mubr.msk.f32.vlgmr.msra.gmra.mxu0 %vm391_vm0, %v429_v42  ;;  %1373 = vmatmul.mubr.msk.f32.vlgmr.msra.gmra.mxu1 %vm391_vm0, %v483_v47 }
 0x11d   : > { %v562_v2 = vpop.f32.mrf.mxu0  ;;  %v635_v3 = vpop.f32.mrf.mxu1 }
 0x11e   : > { %v639_v4 = vmul.f32 %v562_v2, %v562_v2 }
 0x11f   : > { %v1355_v5 = vpop.f32.mrf.mxu0  ;;  %v1374_v6 = vpop.f32.mrf.mxu1 }
 0x120   : > { %v640_v7 = vsub.f32 %v635_v3, %v639_v4 }
 0x122   : > { %v641_v8 = vadd.f32 1e-06, %v640_v7 }
 0x124   : > { %1486 = vrsqrt.f32 %v641_v8 }
 0x131   : > { %v1487_v10 = vpop.eup %1486 }
 0x132   : > { %v1887_v11 = vmul.f32 %v1487_v10, %v643_v9 }
 0x134   : > { %v646_v13 = vmul.f32 %v1887_v11, %v562_v2  ;;  %649 = vst.msk [vmem:[%s328_s11] sm:$0x1] %vm648_vm2, %v1887_v11 }
 0x136   : > { %v1896_v14 = vsub.f32 %v644_v12, %v646_v13 }
 0x138   : > { %650 = vst.msk [vmem:[%s2137_s25] sm:$0x1] %vm648_vm2, %v1896_v14 }
 0x139 LB: >> { %v1257_v15 = vcombine.low %v1872_v61, %v1877_v62  ;;  %v1256_v16 = vcombine.low %v1862_v59, %v1867_v60  ;;  %v684_v17 = vlaneseq  ;;  %s1252_s28 = sshll.u32 %s1610_s26, 7  ;;  %v1255_v19 = vcombine.low %v1852_v57, %v1857_v58  ;;  %s1614_s22 = smov 64   ;;  %s1610_s26 = sphi %s1901_s26, %s665_s26  }
 0x13a   : >> { %s1914_s29 = scalar_lea.vmem %s1723_s27, %s1252_s28  ;;  %v1254_v31 = vcombine.low %v1842_v55, %v1847_v56  ;;  %s1948_s16 = sshra.s32 %s1252_s28, 3  ;;  %vm953_vm3 = vcmask 519168  }
 0x13b   : >> { %1375 = vmatprep.subr.bf16.mxu0 %v1257_v15  ;;  %1399 = vmatprep.subr.bf16.mxu1 %v1257_v15  ;;  %v685_v18 = vshrl.u32 %v684_v17, 7  ;;  %v668_v20 = vld [vmem:[%s1914_s29] sm:$0xff]  ;;  %v669_v21 = vld [vmem:[%s1914_s29 + $0x8] sm:$0xff]  ;;  %v670_v25 = vld [vmem:[%s1914_s29 + $0x10] sm:$0xff]  ;;  %s1282_s17 = sshll.u32 %s1948_s16, 2  ;;  %s665_s26 = sadd.s32 1, %s1610_s26  }
 0x13c   : >> { %1376 = vmatpush3.bf16.msra.mxu0 %v1257_v15  ;;  %1403 = vmatpush3.bf16.msra.mxu1 %v1257_v15  ;;  %v676_v23 = vld [vmem:[%s1914_s29 + $0x40] sm:$0xff]  ;;  %v677_v24 = vld [vmem:[%s1914_s29 + $0x48] sm:$0xff]  ;;  %v671_v28 = vld [vmem:[%s1914_s29 + $0x18] sm:$0xff]  ;;  %s1956_s10 = scalar_lea.vmem %s1728_s14, %s1282_s17  ;;  %s2023_s23 = scalar_lea.vmem %s1733_s18, %s1282_s17 }
 0x13d   : >> { %1377 = vmatprep.subr.bf16.mxu0 %v1256_v16  ;;  %1400 = vmatprep.subr.bf16.mxu1 %v1256_v16  ;;  %v686_v22 = vsub.s32 0, %v685_v18  ;;  %v678_v29 = vld [vmem:[%s1914_s29 + $0x50] sm:$0xff]  ;;  %v679_v30 = vld [vmem:[%s1914_s29 + $0x58] sm:$0xff]  ;;  %v672_v40 = vld [vmem:[%s1914_s29 + $0x20] sm:$0xff]  ;;  %p662_p12 = scmp.ge.s32.totalorder %s665_s26, 2  }
 0x13e   : >> { %v673_v44 = vld [vmem:[%s1914_s29 + $0x28] sm:$0xff]  ;;  %v674_v45 = vld [vmem:[%s1914_s29 + $0x30] sm:$0xff]  ;;  %v675_v48 = vld [vmem:[%s1914_s29 + $0x38] sm:$0xff]  ;;  %s1284_s24 = sshll.u32 (%p662_p12), %s1688_s13, 4  ;;  %s1063_s16 = sshll.u32 (%p662_p12), %s328_s11, 4  ;;  %s1064_s16 = int_to_ptr.vmem [resolvable:$true] %s1063_s16 }
 0x13f   : >> { %v687_v26 = vrot.slane %v1887_v11, %v686_v22  ;;  %v708_v27 = vrot.slane %v1896_v14, %v686_v22  ;;  %v680_v52 = vld [vmem:[%s1914_s29 + $0x60] sm:$0xff]  ;;  %v681_v4 = vld [vmem:[%s1914_s29 + $0x68] sm:$0xff]  ;;  %v682_v5 = vld [vmem:[%s1914_s29 + $0x70] sm:$0xff]  ;;  %s1037_s17 = scalar_lea.sflag (%p662_p12), [#allocation3], %s1716_s21  ;;  %s1615_s18 = smov (%p662_p12), [#allocation2]  }
 0x140   : >> { %1378 = vmatpush3.bf16.msra.mxu0 %v1256_v16  ;;  %1404 = vmatpush3.bf16.msra.mxu1 %v1256_v16  ;;  %v683_v6 = vld [vmem:[%s1914_s29 + $0x78] sm:$0xff]  ;;  %s1061_s29 = scalar_lea.hbm (%p662_p12), %s2124_s6, %s1284_s24  ;;  %s1492_s27 = sshll.u32 (%p662_p12), %s1615_s18, 4  ;;  %s1493_s27 = int_to_ptr.vmem [resolvable:$false] %s1492_s27 }
 0x141   : >> { %1379 = vmatprep.subr.bf16.mxu0 %v1255_v19  ;;  %1401 = vmatprep.subr.bf16.mxu1 %v1255_v19  ;;  %v688_v32 = vmul.f32 %v687_v26, %v668_v20  ;;  %v689_v33 = vmul.f32 %v687_v26, %v669_v21  ;;  %v696_v34 = vmul.f32 %v687_v26, %v676_v23  ;;  %s1494_s14 = scalar_lea.vmem (%p662_p12), %s1493_s27, 32  ;;  %p1495_p2 = scmp.lt.s32.totalorder (%p662_p12), %s1064_s16, %s1493_s27 }
 0x142   : >> { %v697_v35 = vmul.f32 %v687_v26, %v677_v24  ;;  %v690_v36 = vmul.f32 %v687_v26, %v670_v25  ;;  %v691_v37 = vmul.f32 %v687_v26, %v671_v28  ;;  %v698_v38 = vmul.f32 %v687_v26, %v678_v29 }
 0x143   : >> { %v699_v39 = vmul.f32 %v687_v26, %v679_v30  ;;  %v710_v41 = vadd.f32 %v708_v27, %v688_v32  ;;  %v711_v42 = vadd.f32 %v708_v27, %v689_v33  ;;  %v718_v43 = vadd.f32 %v708_v27, %v696_v34 }
 0x144   : >> { %1380 = vmatpush3.bf16.msra.mxu0 %v1255_v19  ;;  %1405 = vmatpush3.bf16.msra.mxu1 %v1255_v19  ;;  %v719_v46 = vadd.f32 %v708_v27, %v697_v35  ;;  %v712_v47 = vadd.f32 %v708_v27, %v690_v36  ;;  %v713_v1 = vadd.f32 %v708_v27, %v691_v37 }
 0x145   : >> { %1381 = vmatprep.subr.bf16.mxu0 %v1254_v31  ;;  %1402 = vmatprep.subr.bf16.mxu1 %v1254_v31  ;;  %v726_v49 = vpack.c.bf16 %v711_v42, %v710_v41  ;;  %v720_v50 = vadd.f32 %v708_v27, %v698_v38  ;;  %v721_v0 = vadd.f32 %v708_v27, %v699_v39 }
 0x146   : >> { %v692_v51 = vmul.f32 %v687_v26, %v672_v40  ;;  %v730_v53 = vpack.c.bf16 %v719_v46, %v718_v43  ;;  %v727_v54 = vpack.c.bf16 %v713_v1, %v712_v47  ;;  %v693_v2 = vmul.f32 %v687_v26, %v673_v44 }
 0x147   : >> { %v694_v3 = vmul.f32 %v687_v26, %v674_v45  ;;  %v731_v7 = vpack.c.bf16 %v721_v0, %v720_v50  ;;  %v695_v9 = vmul.f32 %v687_v26, %v675_v48  ;;  %1383 = vmatprep.mubr.msk.bf16.mxu0 %vm391_vm0, %v726_v49  ;;  %v700_v12 = vmul.f32 %v687_v26, %v680_v52 }
 0x148   : >> { %1382 = vmatpush3.bf16.msra.mxu0 %v1254_v31  ;;  %1406 = vmatpush3.bf16.msra.mxu1 %v1254_v31  ;;  %v714_v8 = vadd.f32 %v708_v27, %v692_v51  ;;  %v715_v10 = vadd.f32 %v708_v27, %v693_v2  ;;  %v701_v15 = vmul.f32 %v687_v26, %v681_v4 }
 0x149   : >> { %1391 = vmatprep.mubr.msk.bf16.mxu1 %vm391_vm0, %v730_v53  ;;  %v716_v13 = vadd.f32 %v708_v27, %v694_v3  ;;  %v702_v16 = vmul.f32 %v687_v26, %v682_v5  ;;  %v703_v17 = vmul.f32 %v687_v26, %v683_v6  ;;  %v717_v19 = vadd.f32 %v708_v27, %v695_v9 }
 0x14a   : >> { %v728_v18 = vpack.c.bf16 %v715_v10, %v714_v8  ;;  %v722_v20 = vadd.f32 %v708_v27, %v700_v12  ;;  %v723_v21 = vadd.f32 %v708_v27, %v701_v15 }
 0x14b   : >> { %1384 = vmatmul.mubr.msk.bf16.vlgmr.msra.gmra.mxu0 %vm391_vm0, %v727_v54  ;;  %1392 = vmatmul.mubr.msk.bf16.vlgmr.msra.gmra.mxu1 %vm391_vm0, %v731_v7  ;;  %v724_v22 = vadd.f32 %v708_v27, %v702_v16  ;;  %v725_v23 = vadd.f32 %v708_v27, %v703_v17  ;;  %v729_v25 = vpack.c.bf16 %v717_v19, %v716_v13 }
 0x14c   : >> { %1387 = vmatprep.mubr.msk.bf16.mxu0 %vm391_vm0, %v728_v18  ;;  %v732_v24 = vpack.c.bf16 %v723_v21, %v722_v20 }
 0x14d   : >> { %v733_v28 = vpack.c.bf16 %v725_v23, %v724_v22 }
 0x14e   : >> { %1395 = vmatprep.mubr.msk.bf16.mxu1 %vm391_vm0, %v732_v24 }
 0x153   : >> { %1388 = vmatmul.mubr.msk.bf16.gmra.mxu0 %vm391_vm0, %v729_v25  ;;  %1396 = vmatmul.mubr.msk.bf16.gmra.mxu1 %vm391_vm0, %v733_v28 }
 0x20b   : >> { %v1385_v26 = vpop.f32.mrf.mxu0  ;;  %v1393_v29 = vpop.f32.mrf.mxu1 }
 0x20c   : >> { %v831_v27 = vadd.f32 %v1385_v26, %v1882_v63  ;;  %v863_v30 = vadd.f32 %v1393_v29, %v1882_v63 }
 0x20d   : >> { %v822_v31 = vpop.f32.mrf.mxu0  ;;  %v854_v32 = vpop.f32.mrf.mxu1 }
 0x20e   : >> { %v1293_v33 = vpack.c.bf16 %v831_v27, %v831_v27  ;;  %v1301_v34 = vpack.c.bf16 %v863_v30, %v863_v30  ;;  %v823_v35 = vadd.f32 %v1882_v63, %v822_v31  ;;  %v855_v36 = vadd.f32 %v1882_v63, %v854_v32 }
 0x20f   : >> { %v1386_v37 = vpop.f32.mrf.mxu0  ;;  %v1394_v38 = vpop.f32.mrf.mxu1 }
 0x210   : >> { %956 = vst.msk [vmem:[%s1956_s10 + $0x8] sm:$0xf] %vm953_vm3, %v1293_v33  ;;  %964 = vst.msk [vmem:[%s1956_s10 + $0x28] sm:$0xf] %vm953_vm3, %v1301_v34  ;;  %v1291_v39 = vpack.c.bf16 %v823_v35, %v823_v35  ;;  %v1299_v40 = vpack.c.bf16 %v855_v36, %v855_v36  ;;  %v834_v41 = vadd.f32 %v1386_v37, %v1882_v63  ;;  %990 = vrot.lane.b32.xlu0 %v1301_v34, %s1614_s22 }
 0x211   : >> { %v866_v42 = vadd.f32 %v1394_v38, %v1882_v63  ;;  %974 = vrot.lane.b32.xlu1 %v1293_v33, %s1614_s22  ;;  %v825_v43 = vpop.f32.mrf.mxu0  ;;  %v857_v44 = vpop.f32.mrf.mxu1 }
 0x212   : >> { %954 = vst.msk [vmem:[%s1956_s10] sm:$0xf] %vm953_vm3, %v1291_v39  ;;  %962 = vst.msk [vmem:[%s1956_s10 + $0x20] sm:$0xf] %vm953_vm3, %v1299_v40  ;;  %v1294_v45 = vpack.c.bf16 %v834_v41, %v834_v41  ;;  %v826_v47 = vadd.f32 %v1882_v63, %v825_v43  ;;  %v858_v1 = vadd.f32 %v1882_v63, %v857_v44 }
 0x213   : >> { %v1302_v46 = vpack.c.bf16 %v866_v42, %v866_v42  ;;  %v1389_v48 = vpop.f32.mrf.mxu0  ;;  %v1397_v49 = vpop.f32.mrf.mxu1 }
 0x214   : >> { %957 = vst.msk [vmem:[%s1956_s10 + $0xc] sm:$0xf] %vm953_vm3, %v1294_v45  ;;  %v1292_v50 = vpack.c.bf16 %v826_v47, %v826_v47  ;;  %v1300_v0 = vpack.c.bf16 %v858_v1, %v858_v1  ;;  %v847_v51 = vadd.f32 %v1389_v48, %v1882_v63  ;;  %970 = vrot.lane.b32.xlu0 %v1291_v39, %s1614_s22 }
 0x215   : >> { %965 = vst.msk [vmem:[%s1956_s10 + $0x2c] sm:$0xf] %vm953_vm3, %v1302_v46  ;;  %v879_v52 = vadd.f32 %v1397_v49, %v1882_v63  ;;  %976 = vrot.lane.b32.xlu1 %v1294_v45, %s1614_s22  ;;  %v838_v53 = vpop.f32.mrf.mxu0  ;;  %v870_v54 = vpop.f32.mrf.mxu1 }
 0x216   : >> { %955 = vst.msk [vmem:[%s1956_s10 + $0x4] sm:$0xf] %vm953_vm3, %v1292_v50  ;;  %963 = vst.msk [vmem:[%s1956_s10 + $0x24] sm:$0xf] %vm953_vm3, %v1300_v0  ;;  %v1297_v2 = vpack.c.bf16 %v847_v51, %v847_v51  ;;  %v839_v3 = vadd.f32 %v1882_v63, %v838_v53  ;;  %v871_v5 = vadd.f32 %v1882_v63, %v870_v54 }
 0x217   : >> { %v1305_v4 = vpack.c.bf16 %v879_v52, %v879_v52  ;;  %v1390_v6 = vpop.f32.mrf.mxu0  ;;  %v1398_v7 = vpop.f32.mrf.mxu1 }
 0x218   : >> { %960 = vst.msk [vmem:[%s1956_s10 + $0x18] sm:$0xf] %vm953_vm3, %v1297_v2  ;;  %v1295_v8 = vpack.c.bf16 %v839_v3, %v839_v3  ;;  %v850_v9 = vadd.f32 %v1390_v6, %v1882_v63  ;;  %986 = vrot.lane.b32.xlu0 %v1299_v40, %s1614_s22  ;;  %v1303_v10 = vpack.c.bf16 %v871_v5, %v871_v5 }
 0x219   : >> { %968 = vst.msk [vmem:[%s1956_s10 + $0x38] sm:$0xf] %vm953_vm3, %v1305_v4  ;;  %v882_v12 = vadd.f32 %v1398_v7, %v1882_v63  ;;  %992 = vrot.lane.b32.xlu1 %v1302_v46, %s1614_s22  ;;  %v841_v13 = vpop.f32.mrf.mxu0  ;;  %v873_v15 = vpop.f32.mrf.mxu1 }
 0x21a   : >> { %958 = vst.msk [vmem:[%s1956_s10 + $0x10] sm:$0xf] %vm953_vm3, %v1295_v8  ;;  %v1298_v16 = vpack.c.bf16 %v850_v9, %v850_v9  ;;  %v842_v17 = vadd.f32 %v1882_v63, %v841_v13  ;;  %966 = vst.msk [vmem:[%s1956_s10 + $0x30] sm:$0xf] %vm953_vm3, %v1303_v10  ;;  %v874_v19 = vadd.f32 %v1882_v63, %v873_v15 }
 0x21b   : >> { %v1306_v18 = vpack.c.bf16 %v882_v12, %v882_v12 }
 0x21c   : >> { %961 = vst.msk [vmem:[%s1956_s10 + $0x1c] sm:$0xf] %vm953_vm3, %v1298_v16  ;;  %v1296_v20 = vpack.c.bf16 %v842_v17, %v842_v17  ;;  %972 = vrot.lane.b32.xlu0 %v1292_v50, %s1614_s22  ;;  %v1304_v21 = vpack.c.bf16 %v874_v19, %v874_v19 }
 0x21d   : >> { %969 = vst.msk [vmem:[%s1956_s10 + $0x3c] sm:$0xf] %vm953_vm3, %v1306_v18  ;;  %988 = vrot.lane.b32.xlu1 %v1300_v0, %s1614_s22 }
 0x21e   : >> { %959 = vst.msk [vmem:[%s1956_s10 + $0x14] sm:$0xf] %vm953_vm3, %v1296_v20  ;;  %967 = vst.msk [vmem:[%s1956_s10 + $0x34] sm:$0xf] %vm953_vm3, %v1304_v21  ;;  %s1488_s10 = scalar_lea.vmem (%p662_p12), %s1064_s16, 16 }
 0x21f   : > { %p1489_p13 = scmp.ne.s32.totalorder (%p662_p12), %s1064_s16, %s1488_s10  ;;  %p1496_p3 = scmp.lt.s32.totalorder (%p662_p12), %s1494_s14, %s1488_s10 }
 0x220   : >> { %982 = vrot.lane.b32.xlu0 %v1297_v2, %s1614_s22 }
 0x221   : >> { %984 = vrot.lane.b32.xlu1 %v1298_v16, %s1614_s22  ;;  %p1490_p0 = pnand (%p662_p12), %p1489_p13, %p1705_p5  ;;  %p1497_p4 = por (%p662_p12), %p1496_p3, %p1495_p2 }
 0x223   : > { %p1491_p1 = pneg (%p662_p12), %p1490_p0 }
 0x224   : >> { %978 = vrot.lane.b32.xlu0 %v1295_v8, %s1614_s22 }
 0x225   : >> { %980 = vrot.lane.b32.xlu1 %v1296_v20, %s1614_s22  ;;  %p1498_p7 = pnand (%p662_p12), %p1497_p4, %p1491_p1 }
 0x228   : >> { %994 = vrot.lane.b32.xlu0 %v1303_v10, %s1614_s22 }
 0x229   : >> { %996 = vrot.lane.b32.xlu1 %v1304_v21, %s1614_s22 }
 0x22c   : >> { %998 = vrot.lane.b32.xlu0 %v1305_v4, %s1614_s22 }
 0x22d   : >> { %1000 = vrot.lane.b32.xlu1 %v1306_v18, %s1614_s22 }
 0x282   : >> { %v991_v22 = vpop.permute.xlu0 %990 }
 0x283   : >> { %1030 = vst.msk [vmem:[%s2023_s23 + $0x28] sm:$0xf] %vm953_vm3, %v991_v22  ;;  %v975_v23 = vpop.permute.xlu1 %974 }
 0x284   : >> { %1022 = vst.msk [vmem:[%s2023_s23 + $0x8] sm:$0xf] %vm953_vm3, %v975_v23 }
 0x286   : >> { %v971_v24 = vpop.permute.xlu0 %970 }
 0x287   : >> { %v977_v25 = vpop.permute.xlu1 %976  ;;  %1020 = vst.msk [vmem:[%s2023_s23] sm:$0xf] %vm953_vm3, %v971_v24 }
 0x288   : >> { %1023 = vst.msk [vmem:[%s2023_s23 + $0xc] sm:$0xf] %vm953_vm3, %v977_v25 }
 0x28a   : >> { %v987_v28 = vpop.permute.xlu0 %986 }
 0x28b   : >> { %v993_v26 = vpop.permute.xlu1 %992  ;;  %1028 = vst.msk [vmem:[%s2023_s23 + $0x20] sm:$0xf] %vm953_vm3, %v987_v28 }
 0x28c   : >> { %1031 = vst.msk [vmem:[%s2023_s23 + $0x2c] sm:$0xf] %vm953_vm3, %v993_v26 }
 0x28e   : >> { %v973_v29 = vpop.permute.xlu0 %972 }
 0x28f   : >> { %v989_v27 = vpop.permute.xlu1 %988  ;;  %1021 = vst.msk [vmem:[%s2023_s23 + $0x4] sm:$0xf] %vm953_vm3, %v973_v29 }
 0x290   : >> { %1029 = vst.msk [vmem:[%s2023_s23 + $0x24] sm:$0xf] %vm953_vm3, %v989_v27 }
 0x292   : >> { %v983_v30 = vpop.permute.xlu0 %982 }
 0x293   : >> { %v985_v31 = vpop.permute.xlu1 %984  ;;  %1026 = vst.msk [vmem:[%s2023_s23 + $0x18] sm:$0xf] %vm953_vm3, %v983_v30 }
 0x294   : >> { %1027 = vst.msk [vmem:[%s2023_s23 + $0x1c] sm:$0xf] %vm953_vm3, %v985_v31 }
 0x296   : >> { %v979_v32 = vpop.permute.xlu0 %978 }
 0x297   : >> { %v981_v33 = vpop.permute.xlu1 %980  ;;  %1024 = vst.msk [vmem:[%s2023_s23 + $0x10] sm:$0xf] %vm953_vm3, %v979_v32 }
 0x298   : >> { %1025 = vst.msk [vmem:[%s2023_s23 + $0x14] sm:$0xf] %vm953_vm3, %v981_v33 }
 0x29a   : >> { %v995_v34 = vpop.permute.xlu0 %994 }
 0x29b   : >> { %v997_v35 = vpop.permute.xlu1 %996  ;;  %1032 = vst.msk [vmem:[%s2023_s23 + $0x30] sm:$0xf] %vm953_vm3, %v995_v34 }
 0x29c   : >> { %1033 = vst.msk [vmem:[%s2023_s23 + $0x34] sm:$0xf] %vm953_vm3, %v997_v35  ;;  %664 = sbr.rel (!%p662_p12) target bundleno = 313 (0x139), region = 149 }
 0x29e   : >> { %v999_v36 = vpop.permute.xlu0 %998 }
 0x29f   : >> { %v1001_v37 = vpop.permute.xlu1 %1000  ;;  %1034 = vst.msk [vmem:[%s2023_s23 + $0x38] sm:$0xf] %vm953_vm3, %v999_v36 }
 0x2a0   : >> { %1035 = vst.msk [vmem:[%s2023_s23 + $0x3c] sm:$0xf] %vm953_vm3, %v1001_v37 }
 0x2a1   : > { %1501 = shalt.err (!%p1498_p7)
}
 0x2a2   : > { %s1502_s26 = scalar_lea.hbm %s1061_s29, 16  ;;  %s1506_s23 = scalar_lea.hbm %s2124_s6, 32 }
 0x2a3   : > { %p1503_p8 = scmp.ne.s32.totalorder %s1061_s29, %s1502_s26  ;;  %p1507_p11 = scmp.lt.s32.totalorder %s1061_s29, %s2124_s6 }
 0x2a4   : > { %p1508_p12 = scmp.lt.s32.totalorder %s1506_s23, %s1502_s26 }
 0x2a5   : > { %p1504_p9 = pnand %p1503_p8, %p1705_p5 }
 0x2a6   : > { %p1509_p13 = por %p1508_p12, %p1507_p11 }
 0x2a7   : > { %p1505_p10 = pneg %p1504_p9 }
 0x2a9   : > { %p1510_p0 = pnand %p1509_p13, %p1505_p10 }
 0x2ab   : > { %1513 = shalt.err (!%p1510_p0)
}
 0x2ac   : > { %1407 = dma.vmem_to_hbm [thread:$0]  (%p1705_p5), %s1064_s16, 16, %s1061_s29, %s1037_s17  }
 0x2ad   : > { %s1074_s27 = scalar_lea.hbm %s2125_s7, %s1284_s24  ;;  %s2138_s14 = scalar_lea.vmem [#allocation4], %s1716_s21 }
 0x2ae   : > { %s1076_s11 = sshll.u32 %s2138_s14, 4  ;;  %s1041_s22 = scalar_lea.sflag [#allocation5], %s1716_s21  ;;  %s1077_s11 = int_to_ptr.vmem [resolvable:$true] %s1076_s11 }
 0x2af   : > { %s1514_s26 = scalar_lea.vmem %s1077_s11, 16  ;;  %s1616_s23 = smov [#allocation4]  }
 0x2b0   : > { %p1515_p1 = scmp.ne.s32.totalorder %s1077_s11, %s1514_s26  ;;  %s1518_s25 = sshll.u32 %s1616_s23, 4  ;;  %s1519_s25 = int_to_ptr.vmem [resolvable:$false] %s1518_s25 }
 0x2b1   : > { %s1520_s28 = scalar_lea.vmem %s1519_s25, 32  ;;  %p1521_p4 = scmp.lt.s32.totalorder %s1077_s11, %s1519_s25 }
 0x2b2   : > { %p1516_p2 = pnand %p1515_p1, %p1705_p5  ;;  %p1522_p7 = scmp.lt.s32.totalorder %s1520_s28, %s1514_s26 }
 0x2b4   : > { %p1517_p3 = pneg %p1516_p2  ;;  %p1523_p8 = por %p1522_p7, %p1521_p4 }
 0x2b6   : > { %p1524_p9 = pnand %p1523_p8, %p1517_p3 }
 0x2b8   : > { %1527 = shalt.err (!%p1524_p9)
}
 0x2b9   : > { %s1528_s13 = scalar_lea.hbm %s1074_s27, 16  ;;  %s1532_s29 = scalar_lea.hbm %s2125_s7, 32 }
 0x2ba   : > { %p1529_p10 = scmp.ne.s32.totalorder %s1074_s27, %s1528_s13  ;;  %p1533_p13 = scmp.lt.s32.totalorder %s1074_s27, %s2125_s7 }
 0x2bb   : > { %p1534_p0 = scmp.lt.s32.totalorder %s1532_s29, %s1528_s13 }
 0x2bc   : > { %p1530_p11 = pnand %p1529_p10, %p1705_p5 }
 0x2bd   : > { %p1535_p1 = por %p1534_p0, %p1533_p13 }
 0x2be   : > { %p1531_p12 = pneg %p1530_p11 }
 0x2c0   : > { %p1536_p2 = pnand %p1535_p1, %p1531_p12 }
 0x2c2   : > { %1539 = shalt.err (!%p1536_p2)
}
 0x2c3   : > { %1408 = dma.vmem_to_hbm [thread:$0]  (%p1705_p5), %s1077_s11, 16, %s1074_s27, %s1041_s22  }
 0x2c4 PF: > { %p1418_p3 = scmp.ge.s32.totalorder %s1594_s12, 2  ;;  %s1094_s10 = sand.u32 1, %s1582_s30  }
 0x2c5   : > { %s1095_s18 = scalar_lea.sflag [#allocation3], %s1094_s10 }
 0x2c6   : > { %p1412_p4 = pnand %p1418_p3, %p1709_p6 }
 0x2c8   : > { %p1413_p7 = pneg %p1412_p4 }
 0x2ca   : > { %1573 = dma.done.wait (%p1413_p7), %s1095_s18, 16  }
 0x2cb   : > { %1575 = vsyncadd (%p1413_p7), %s1095_s18, 4294967280  ;;  %s1103_s14 = scalar_lea.sflag [#allocation5], %s1094_s10 }
 0x2cc   : > { %1577 = dma.done.wait (%p1413_p7), %s1103_s14, 16  }
 0x2cd   : > { %1579 = vsyncadd (%p1413_p7), %s1103_s14, 4294967280  ;;  %s2139_s30 = sld [smem:[#allocation8_spill]]  ;;  %p23_p5 = scmp.ge.s32.totalorder %s1692_s15, 4  }
 0x2ce   : > { %s2140_s10 = sld [smem:[#allocation9_spill]]  ;;  %s2142_s12 = smov %s1692_s15 }
 0x2cf   : > { %s2141_s11 = sld [smem:[#allocation10_spill]]  ;;  %25 = sbr.rel (!%p23_p5) target bundleno = 5 (0x5), region = 160 }
 0x2d4   :  { %1123 = vsyncpa [#allocation3], 1 }
 0x2d5   :  { %1125 = vsyncpa [#allocation3 + $0x1], 1 }
 0x2d6   :  { %1126 = vsyncpa [#allocation5], 1 }
 0x2d7   :  { %1128 = vsyncpa [#allocation5 + $0x1], 1 }

</bundles_post_ra>
